<compile_context>
chip_gen: v7x
topology: tpu7x:2x2x1
jax: 0.10.0
libtpu: 0.0.40
codegen_flags: <defaults>
</compile_context>

<pallas_src>
import functools

import jax
import jax.numpy as jnp
from jax import lax
from jax.experimental import pallas as pl
from jax.experimental.pallas import tpu as pltpu


def _round_up(x, m):
    return ((x + m - 1) // m) * m


def _ohem_pixel_kernel(score_ref, tgt_ref, out_ref, *, ignore_label):
    """Per-pixel cross entropy + softmax prob of the target class.

    score_ref: (1, C, T) logits (any float dtype, upcast to f32 in-kernel)
    tgt_ref:   (1, 1, T) int32 labels (may contain ignore_label)
    out_ref:   (1, 2, T) f32  [row 0: CE loss (0 where ignored),
                               row 1: prob of target class (2.0 where ignored)]
    """
    s = score_ref[0].astype(jnp.float32)                  # (C, T)
    t = tgt_ref[0]                                        # (1, T) int32
    num_classes, tile = s.shape

    # numerically-stable softmax stats over classes (sublane axis -> XLU)
    m = jnp.max(s, axis=0, keepdims=True)                 # (1, T)
    sumexp = jnp.sum(jnp.exp(s - m), axis=0, keepdims=True)

    valid = t != ignore_label                             # (1, T) bool
    t_safe = jnp.where(valid, t, 0)

    # gather logit of the target class via one-hot select + sublane reduce
    class_ids = lax.broadcasted_iota(jnp.int32, (num_classes, tile), 0)
    onehot = class_ids == t_safe                          # (C, T) bool
    s_t = jnp.sum(jnp.where(onehot, s, 0.0), axis=0, keepdims=True)

    log_z = jnp.log(sumexp)
    loss = (m + log_z) - s_t                              # -log softmax[target]
    prob = jnp.exp(s_t - m) / sumexp                      # softmax[target]

    loss_row = jnp.where(valid, loss, 0.0)                # (1, T)
    prob_row = jnp.where(valid, prob, 2.0)                # (1, T) (2.0 sorts last)

    # Assemble the (2, T) block with a sublane-broadcasted select (no partial
    # stores, no concat lowering corner cases), then one full-block write.
    row_ids = lax.broadcasted_iota(jnp.int32, (2, tile), 0)
    out_block = jnp.where(row_ids == 0, loss_row, prob_row)   # (2, T)
    out_ref[...] = out_block[None]                             # (1, 2, T)


def _ohem_pixel_stats(score3d, target3d, ignore_label, tile_p):
    """score3d: (N, C, HW_pad), target3d: (N, 1, HW_pad) -> (N, 2, HW_pad) f32."""
    N, C, HW = score3d.shape
    assert HW % tile_p == 0
    kern = functools.partial(_ohem_pixel_kernel, ignore_label=ignore_label)
    out = pl.pallas_call(
        kern,
        grid=(N, HW // tile_p),
        in_specs=[
            pl.BlockSpec((1, C, tile_p), lambda b, j: (b, 0, j)),
            pl.BlockSpec((1, 1, tile_p), lambda b, j: (b, 0, j)),
        ],
        out_specs=pl.BlockSpec((1, 2, tile_p), lambda b, j: (b, 0, j)),
        out_shape=jax.ShapeDtypeStruct((N, 2, HW), jnp.float32),
        compiler_params=pltpu.CompilerParams(
            dimension_semantics=("parallel", "parallel")),
    )(score3d, target3d)
    return out[:, 0, :], out[:, 1, :]


class OhemCrossEntropy:
    """JAX/Pallas port of the PyTorch OhemCrossEntropy forward pass."""

    def __init__(self, ignore_label=-1, thres=0.7, min_kept=100000, weight=None):
        self.thresh = float(thres)
        self.min_kept = max(1, int(min_kept))
        self.ignore_label = int(ignore_label)
        # TODO(synk): per-class weights (nn.CrossEntropyLoss weight=) not wired in;
        # the module default (weight=None) is implemented.
        self.weight = weight

    @staticmethod
    def _choose_tile_p(hw, num_classes, itemsize):
        # Aim for ~2 MiB per score input block (double-buffered -> ~4 MiB), which
        # stays well under the scoped-VMEM defaults on v5e/v6e/v7x, with a lane
        # tile that is a multiple of 128.
        budget = 2 * 1024 * 1024
        cap = max(512, min(65536, budget // max(1, num_classes * itemsize)))
        cap = max(128, (cap // 128) * 128)
        hw128 = _round_up(hw, 128)
        return hw128 if hw128 <= cap else cap

    def _ohem_forward(self, score, target):
        # layout: score NCHW, target (N, H, W)
        N, C, H, W = score.shape
        th, tw = target.shape[1], target.shape[2]
        # TODO(synk): bilinear F.interpolate(align_corners=True) path when the
        # score spatial size differs from the target spatial size.
        assert (H, W) == (th, tw), "interpolation path not implemented"

        HW = H * W
        tile_p = self._choose_tile_p(HW, C, jnp.dtype(score.dtype).itemsize)
        HW_pad = _round_up(HW, tile_p)

        # Free reshape from NCHW (no transpose, no dtype upcast in the wrapper —
        # bf16 logits stream into the kernel at half the HBM bytes).
        score3d = score.reshape(N, C, HW)
        target3d = target.reshape(N, 1, HW).astype(jnp.int32)
        if HW_pad != HW:
            score3d = jnp.pad(score3d, ((0, 0), (0, 0), (0, HW_pad - HW)))
            target3d = jnp.pad(target3d, ((0, 0), (0, 0), (0, HW_pad - HW)),
                               constant_values=self.ignore_label)

        loss2d, prob2d = _ohem_pixel_stats(score3d, target3d,
                                           self.ignore_label, tile_p)
        loss = loss2d.reshape(-1)
        prob = prob2d.reshape(-1)
        # validity is just (target != ignore_label); no third kernel output needed
        valid = target3d.reshape(-1) != self.ignore_label

        # --- OHEM selection (plain-JAX glue; k-th order statistic + masked mean) ---
        # TODO(synk): at production P (millions of pixels) replace the full sort
        # with an in-kernel histogram / partial selection for the k-th smallest prob.
        n_valid = jnp.sum(valid).astype(jnp.int32)
        sorted_prob = jnp.sort(prob)        # invalid / pad entries are 2.0 -> sort last
        total = prob.shape[0]
        k = jnp.clip(jnp.minimum(jnp.int32(self.min_kept), n_valid - 1), 0, total - 1)
        min_value = jnp.take(sorted_prob, k)
        threshold = jnp.maximum(min_value, jnp.float32(self.thresh))
        sel = valid & (prob < threshold)
        selected = sel.astype(jnp.float32)
        num_sel = jnp.sum(selected)
        loss_sum = jnp.sum(loss * selected)
        # guard: empty selection (or no valid pixels) -> 0.0 instead of NaN
        return jnp.where(num_sel > 0, loss_sum / jnp.maximum(num_sel, 1.0),
                         jnp.float32(0.0))

    def __call__(self, score, target):
        # forward(): score wrapped in a 1-element list with weight 1.0 -> the
        # result is exactly 1.0 * _ohem_forward(score, target).
        scores = [score]
        balance_weights = [1.0]
        assert len(balance_weights) == len(scores)
        return sum(w * self._ohem_forward(x, target)
                   for w, x in zip(balance_weights, scores))


def _reference_ohem(score, target, ignore_label, thres, min_kept):
    """Pure-JAX reference mirroring the PyTorch semantics."""
    N, C, H, W = score.shape
    s = jnp.transpose(score, (0, 2, 3, 1)).reshape(-1, C).astype(jnp.float32)
    t = target.reshape(-1)
    lse = jax.scipy.special.logsumexp(s, axis=1)
    valid = t != ignore_label
    t_safe = jnp.where(valid, t, 0)
    s_t = jnp.take_along_axis(s, t_safe[:, None].astype(jnp.int32), axis=1)[:, 0]
    loss = lse - s_t
    prob = jnp.exp(s_t - lse)
    n_valid = int(jnp.sum(valid))
    sorted_prob = jnp.sort(jnp.where(valid, prob, 2.0))
    k = min(min_kept, n_valid - 1)
    min_value = float(sorted_prob[k])
    threshold = max(min_value, thres)
    sel = valid & (prob < threshold)
    return float(jnp.sum(jnp.where(sel, loss, 0.0)) / jnp.sum(sel))


if __name__ == "__main__":
    key = jax.random.PRNGKey(0)
    k_score, k_tgt, k_ign = jax.random.split(key, 3)

    N, C, H, W = 2, 4, 16, 16
    score = jax.random.normal(k_score, (N, C, H, W), dtype=jnp.float32)
    target = jax.random.randint(k_tgt, (N, H, W), 0, C, dtype=jnp.int32)
    # sprinkle some ignore_label pixels to exercise the mask path
    ignore_mask = jax.random.bernoulli(k_ign, p=0.1, shape=(N, H, W))
    target = jnp.where(ignore_mask, -1, target)

    ohem = OhemCrossEntropy(ignore_label=-1, thres=0.7, min_kept=100000)
    out = ohem(score, target)
    out = jax.block_until_ready(out)

    ref = _reference_ohem(score, target, ignore_label=-1, thres=0.7, min_kept=100000)
    assert abs(float(out) - ref) < 1e-4, (float(out), ref)

    print("KERNEL_OK")
</pallas_src>

<mosaic_0001>
module attributes {stable_mosaic.version = 11 : i64} {
  func.func @_ohem_pixel_kernel(%arg0: i32, %arg1: i32, %arg2: memref<1x4x256xf32, #tpu.memory_space<vmem>>, %arg3: memref<1x1x256xi32, #tpu.memory_space<vmem>>, %arg4: memref<1x2x256xf32, #tpu.memory_space<vmem>>) attributes {dimension_semantics = [#tpu.dimension_semantics<parallel>, #tpu.dimension_semantics<parallel>], iteration_bounds = array<i64: 2, 1>, scalar_prefetch = 0 : i64, scratch_operands = 0 : i64, tpu.core_type = #tpu.core_type<tc>, window_params = [{transform_indices = @transform_0, window_bounds = array<i64: 1, 4, 256>}, {transform_indices = @transform_1, window_bounds = array<i64: 1, 1, 256>}, {transform_indices = @transform_2, window_bounds = array<i64: 1, 2, 256>}]} {
    %c0 = arith.constant 0 : index
    %c0_0 = arith.constant 0 : index
    %c0_1 = arith.constant 0 : index
    %0 = vector.load %arg2[%c0, %c0_0, %c0_1] : memref<1x4x256xf32, #tpu.memory_space<vmem>>, vector<1x4x256xf32>
    %1 = vector.shape_cast %0 : vector<1x4x256xf32> to vector<4x256xf32>
    %c0_2 = arith.constant 0 : index
    %c0_3 = arith.constant 0 : index
    %c0_4 = arith.constant 0 : index
    %2 = vector.load %arg3[%c0_2, %c0_3, %c0_4] : memref<1x1x256xi32, #tpu.memory_space<vmem>>, vector<1x1x256xi32>
    %3 = vector.shape_cast %2 : vector<1x1x256xi32> to vector<1x256xi32>
    %cst = arith.constant dense<0xFF800000> : vector<256xf32>
    %4 = vector.multi_reduction <maximumf>, %1, %cst [0] : vector<4x256xf32> to vector<256xf32>
    %5 = vector.shape_cast %4 : vector<256xf32> to vector<1x256xf32>
    %6 = vector.broadcast %5 : vector<1x256xf32> to vector<4x256xf32>
    %7 = arith.subf %1, %6 : vector<4x256xf32>
    %8 = math.exp %7 : vector<4x256xf32>
    %cst_5 = arith.constant dense<0.000000e+00> : vector<256xf32>
    %9 = vector.multi_reduction <add>, %8, %cst_5 [0] : vector<4x256xf32> to vector<256xf32>
    %10 = vector.shape_cast %9 : vector<256xf32> to vector<1x256xf32>
    %c-1_i32 = arith.constant -1 : i32
    %11 = vector.broadcast %c-1_i32 : i32 to vector<1x256xi32>
    %12 = arith.cmpi ne, %3, %11 : vector<1x256xi32>
    %c0_i32 = arith.constant 0 : i32
    %13 = vector.broadcast %c0_i32 : i32 to vector<1x256xi32>
    %14 = arith.select %12, %3, %13 : vector<1x256xi1>, vector<1x256xi32>
    %15 = tpu.iota {dimensions = array<i32: 0>} : vector<4x256xi32>
    %16 = vector.broadcast %14 : vector<1x256xi32> to vector<4x256xi32>
    %17 = arith.cmpi eq, %15, %16 : vector<4x256xi32>
    %cst_6 = arith.constant 0.000000e+00 : f32
    %18 = vector.broadcast %cst_6 : f32 to vector<4x256xf32>
    %19 = arith.select %17, %1, %18 : vector<4x256xi1>, vector<4x256xf32>
    %cst_7 = arith.constant dense<0.000000e+00> : vector<256xf32>
    %20 = vector.multi_reduction <add>, %19, %cst_7 [0] : vector<4x256xf32> to vector<256xf32>
    %21 = vector.shape_cast %20 : vector<256xf32> to vector<1x256xf32>
    %22 = math.log %10 : vector<1x256xf32>
    %23 = arith.addf %5, %22 : vector<1x256xf32>
    %24 = arith.subf %23, %21 : vector<1x256xf32>
    %25 = arith.subf %21, %5 : vector<1x256xf32>
    %26 = math.exp %25 : vector<1x256xf32>
    %27 = arith.divf %26, %10 : vector<1x256xf32>
    %cst_8 = arith.constant 0.000000e+00 : f32
    %28 = vector.broadcast %cst_8 : f32 to vector<1x256xf32>
    %29 = arith.select %12, %24, %28 : vector<1x256xi1>, vector<1x256xf32>
    %cst_9 = arith.constant 2.000000e+00 : f32
    %30 = vector.broadcast %cst_9 : f32 to vector<1x256xf32>
    %31 = arith.select %12, %27, %30 : vector<1x256xi1>, vector<1x256xf32>
    %32 = tpu.iota {dimensions = array<i32: 0>} : vector<2x256xi32>
    %c0_i32_10 = arith.constant 0 : i32
    %33 = vector.broadcast %c0_i32_10 : i32 to vector<2x256xi32>
    %34 = arith.cmpi eq, %32, %33 : vector<2x256xi32>
    %35 = vector.shape_cast %29 : vector<1x256xf32> to vector<1x256xf32>
    %36 = vector.broadcast %35 : vector<1x256xf32> to vector<2x256xf32>
    %37 = vector.shape_cast %31 : vector<1x256xf32> to vector<1x256xf32>
    %38 = vector.broadcast %37 : vector<1x256xf32> to vector<2x256xf32>
    %39 = arith.select %34, %36, %38 : vector<2x256xi1>, vector<2x256xf32>
    %40 = vector.shape_cast %39 : vector<2x256xf32> to vector<1x2x256xf32>
    %c0_11 = arith.constant 0 : index
    %c0_12 = arith.constant 0 : index
    %c0_13 = arith.constant 0 : index
    %41 = vector.load %arg4[%c0_11, %c0_12, %c0_13] : memref<1x2x256xf32, #tpu.memory_space<vmem>>, vector<1x2x256xf32>
    tpu.vector_store %arg4[%c0_11, %c0_12, %c0_13], %40 {strides = array<i32>} : memref<1x2x256xf32, #tpu.memory_space<vmem>>, vector<1x2x256xf32>,
    return
  }
  func.func @transform_0(%arg0: i32, %arg1: i32) -> (i32, i32, i32) {
    %c0_i32 = arith.constant 0 : i32
    %c0_i32_0 = arith.constant 0 : i32
    return %arg0, %c0_i32, %arg1 : i32, i32, i32
  }
  func.func @transform_1(%arg0: i32, %arg1: i32) -> (i32, i32, i32) {
    %c0_i32 = arith.constant 0 : i32
    %c0_i32_0 = arith.constant 0 : i32
    return %arg0, %c0_i32, %arg1 : i32, i32, i32
  }
  func.func @transform_2(%arg0: i32, %arg1: i32) -> (i32, i32, i32) {
    %c0_i32 = arith.constant 0 : i32
    %c0_i32_0 = arith.constant 0 : i32
    return %arg0, %c0_i32, %arg1 : i32, i32, i32
  }
}

</mosaic_0001>

<bundles_post_ra>
// kernel: tpu_custom_call.1
= control target key start
LH: loop header
LB: loop body
LE: loop exit
PB: predicated region body
PF: predicated region fallthrough
CT: control target
= control target key end

     0   :  { %7 = vsyncpa [#allocation3], 0  ;;  %s1040_s0 = inlined_call_operand.hbm [shape: f32[2,4,256], index: 0, kind: input, shape index: {}]   ;;  %s1041_s1 = inlined_call_operand.hbm [shape: s32[2,1,256], index: 1, kind: input, shape index: {}]   ;;  %s1042_s2 = inlined_call_operand.hbm [shape: f32[2,2,256], index: 2, kind: output, shape index: {}]  }
   0x1   :  { %9 = vsyncpa [#allocation3 + $0x1], 0 }
   0x2   :  { %10 = vsyncpa [#allocation6], 0 }
   0x3   :  { %12 = vsyncpa [#allocation6 + $0x1], 0 }
   0x4   :  { %13 = vsyncpa [#allocation4], 0 }
   0x5   :  { %15 = vsyncpa [#allocation4 + $0x1], 0  ;;  %s790_s9 = smov 0   ;;  %s792_s10 = smov 0  }
   0x6   :  { %s794_s11 = smov 0   ;;  %s796_s12 = smov 0  }
   0x7   :  { %s798_s13 = smov 0   ;;  %s800_s14 = smov 0  }
   0x8 LB: > { %s517_s15 = sadd.s32 4294967295, %s769_s14   ;;  %s518_s16 = sadd.s32 4294967294, %s769_s14   ;;  %s769_s14 = sphi %s800_s14, %s21_s14   ;;  %s765_s13 = sphi %s798_s13, %s1062_s13   ;;  %s761_s12 = sphi %s796_s12, %s1061_s12   ;;  %s757_s11 = sphi %s794_s11, %s1060_s11   ;;  %s753_s10 = sphi %s792_s10, %s1059_s10   ;;  %s749_s9 = sphi %s790_s9, %s1058_s9  }
   0x9   : > { %s33_s17 = sadd.s32 1, %s765_s13  ;;  %s42_s18 = sadd.s32 1, %s757_s11 }
   0xa   : > { %p35_p0 = scmp.ge.s32.totalorder %s33_s17, 2  ;;  %p49_p1 = scmp.ne.s32.totalorder %s757_s11, %s753_s10 }
   0xb   : > { %p50_p2 = scmp.eq.s32.totalorder %s769_s14, 0  ;;  %p55_p3 = scmp.ne.s32.totalorder %s753_s10, %s749_s9 }
   0xc   : > { %s1064_s17 = smov (%p35_p0, %s33_s17), 0  ;;  %p56_p5 = scmp.eq.s32.totalorder %s517_s15, 0 }
   0xd   : > { %p831_p4 = por %p50_p2, %p49_p1  ;;  %s37_s20 = ssub.s32 %s765_s13, %s1064_s17 }
   0xe   : > { %p109_p6 = scmp.eq.s32.totalorder %s517_s15, 1  ;;  %p40_p7 = scmp.eq.s32.totalorder %s37_s20, 0 }
   0xf   : > { %p837_p8 = por %p56_p5, %p55_p3  ;;  %p115_p10 = scmp.eq.s32.totalorder %s518_s16, 1 }
  0x10   : > { %p841_p9 = por %p109_p6, %p49_p1  ;;  %p557_p13 = scmp.lt.s32.totalorder %s769_s14, 2 }
  0x11   : > { %s1046_s21 = scalar_select %p837_p8, 1, 0 }
  0x12   : > { %s1047_s22 = scalar_select %p841_p9, 1, 0 }
  0x13   : > { %s846_s23 = scalar_select %p40_p7, %s757_s11, %s42_s18  }
  0x14   : > { %p848_p11 = por %p115_p10, %p55_p3  ;;  %s855_s25 = sand.u32 1, %s757_s11  }
  0x15   : > { %s521_s26 = sshll.u32 %s855_s25, 3  ;;  %s537_s27 = sshll.u32 %s765_s13, 7 }
  0x16   : > { %s1048_s24 = scalar_select %p848_p11, 1, 0 }
  0x17   : > { %s862_s30 = scalar_lea.hbm %s1040_s0, %s537_s27  ;;  %s139_s3 = scalar_lea.vmem [#allocation2], %s521_s26 }
  0x18   : > { %s149_s4 = sshll.u32 %s139_s3, 4  ;;  %p868_p0 = pnand %p557_p13, %p831_p4  ;;  %s864_s4 = int_to_ptr.vmem [resolvable:$true] %s149_s4 }
  0x19   : > { %s136_s6 = scalar_lea.sflag [#allocation3], %s855_s25  ;;  %s623_s7 = scalar_lea.hbm %s862_s30, 128 }
  0x1a   : > { %p624_p3 = scmp.ne.s32.totalorder %s862_s30, %s623_s7  ;;  %p625_p5 = pneg %p868_p0 }
  0x1b   : > { %s628_s16 = scalar_lea.hbm %s1040_s0, 256  ;;  %p629_p4 = scmp.lt.u32.totalorder %s862_s30, %s1040_s0 }
  0x1c   : > { %p626_p6 = pnand %p625_p5, %p624_p3  ;;  %p630_p10 = scmp.lt.u32.totalorder %s628_s16, %s623_s7 }
  0x1d   : > { %p632_p12 = scmp.lt.u32.totalorder %s623_s7, %s862_s30 }
  0x1e   : > { %p627_p7 = pneg %p626_p6  ;;  %p631_p13 = por %p630_p10, %p629_p4 }
  0x20   : > { %p633_p1 = por %p632_p12, %p631_p13 }
  0x22   : > { %p634_p2 = pnand %p633_p1, %p627_p7 }
  0x24   : > { %637 = shalt.err (!%p634_p2)
}
  0x25   : > { %s638_s20 = scalar_lea.vmem %s864_s4, 128  ;;  %s771_s26 = smov [#allocation2]  }
  0x26   : > { %p639_p3 = scmp.ne.s32.totalorder %s864_s4, %s638_s20  ;;  %s643_s27 = sshll.u32 %s771_s26, 4  ;;  %s644_s27 = int_to_ptr.vmem [resolvable:$false] %s643_s27 }
  0x27   : > { %s645_s28 = scalar_lea.vmem %s644_s27, 256  ;;  %p646_p9 = scmp.lt.s32.totalorder %s864_s4, %s644_s27 }
  0x28   : > { %p641_p6 = pnand %p639_p3, %p625_p5  ;;  %p647_p4 = scmp.lt.s32.totalorder %s645_s28, %s638_s20 }
  0x2a   : > { %p642_p11 = pneg %p641_p6  ;;  %p648_p10 = por %p647_p4, %p646_p9 }
  0x2c   : > { %p649_p12 = pnand %p648_p10, %p642_p11 }
  0x2e   : > { %652 = shalt.err (!%p649_p12)
}
  0x2f   : > { %549 = dma.hbm_to_vmem [thread:$0]  (!%p868_p0), %s862_s30, 128, %s864_s4, %s136_s6  }
  0x30   : > { %p1050_p1 = scmp.lt.s32.totalorder %s769_s14, 3  ;;  %p1051_p2 = scmp.ge.s32.totalorder %s769_s14, 1 }
  0x31   : > { %s524_s3 = sshll.u32 %s855_s25, 1  ;;  %s538_s7 = sshll.u32 %s765_s13, 5 }
  0x32   : > { %p904_p7 = pnand %p1051_p2, %p1050_p1  ;;  %s913_s16 = scalar_lea.hbm %s1041_s1, %s538_s7 }
  0x33   : > { %s160_s18 = scalar_lea.vmem [#allocation5], %s524_s3  ;;  %s157_s30 = scalar_lea.sflag [#allocation6], %s855_s25 }
  0x34   : > { %s1052_s29 = scalar_select %p904_p7, 1, 0 }
  0x35   : > { %s170_s19 = sshll.u32 %s160_s18, 4  ;;  %s653_s4 = scalar_lea.hbm %s913_s16, 32  ;;  %s171_s19 = int_to_ptr.vmem [resolvable:$true] %s170_s19 }
  0x36   : > { %p654_p9 = scmp.ne.s32.totalorder %s913_s16, %s653_s4  ;;  %s658_s26 = scalar_lea.hbm %s1041_s1, 64 }
  0x37   : > { %p659_p3 = scmp.lt.u32.totalorder %s913_s16, %s1041_s1  ;;  %p660_p6 = scmp.lt.u32.totalorder %s658_s26, %s653_s4 }
  0x38   : > { %p656_p11 = pnand %p654_p9, %p625_p5  ;;  %p662_p10 = scmp.lt.u32.totalorder %s653_s4, %s913_s16 }
  0x39   : > { %p661_p4 = por %p660_p6, %p659_p3 }
  0x3a   : > { %p657_p13 = pneg %p656_p11 }
  0x3b   : > { %p663_p12 = por %p662_p10, %p661_p4 }
  0x3d   : > { %p664_p1 = pnand %p663_p12, %p657_p13 }
  0x3f   : > { %667 = shalt.err (!%p664_p1)
}
  0x40   : > { %s668_s25 = scalar_lea.vmem %s171_s19, 32  ;;  %s772_s3 = smov [#allocation5]  }
  0x41   : > { %p669_p2 = scmp.ne.s32.totalorder %s171_s19, %s668_s25  ;;  %s673_s7 = sshll.u32 %s772_s3, 4  ;;  %s674_s7 = int_to_ptr.vmem [resolvable:$false] %s673_s7 }
  0x42   : > { %s675_s8 = scalar_lea.vmem %s674_s7, 64  ;;  %p676_p8 = scmp.lt.s32.totalorder %s171_s19, %s674_s7 }
  0x43   : > { %p671_p9 = pnand %p669_p2, %p625_p5  ;;  %p677_p7 = scmp.lt.s32.totalorder %s675_s8, %s668_s25 }
  0x45   : > { %p672_p11 = pneg %p671_p9  ;;  %p678_p3 = por %p677_p7, %p676_p8 }
  0x47   : > { %p679_p6 = pnand %p678_p3, %p672_p11 }
  0x49   : > { %682 = shalt.err (!%p679_p6)
}
  0x4a   : > { %552 = dma.hbm_to_vmem [thread:$0]  (!%p868_p0), %s913_s16, 32, %s171_s19, %s157_s30  }
  0x4b   : > { %p1053_p13 = scmp.ne.s32.totalorder %s1052_s29, 0 }
  0x4c   : > { %s938_s15 = sand.u32 (!%p1053_p13), 1, %s753_s10   ;;  %p1054_p5 = scmp.ne.s32.totalorder (!%p1053_p13), %s1046_s21, 0 }
  0x4d   : > { %179 = sbr.rel (%p1053_p13) target bundleno = 179 (0xb3), region = 28  ;;  %s528_s18 = sshll.u32 (!%p1053_p13), %s938_s15, 3 }
  0x4e   : > { %s182_s4 = scalar_lea.sflag (!%p1053_p13), [#allocation3], %s938_s15  ;;  %s185_s6 = scalar_lea.vmem (!%p1053_p13), [#allocation2], %s528_s18 }
  0x54   : > { %736 = dma.done.wait (%p1054_p5), %s182_s4, 128  }
  0x55   : > { %738 = vsyncadd (%p1054_p5), %s182_s4, 4294967168  ;;  %s529_s5 = sshll.u32 %s938_s15, 1  ;;  %s191_s29 = scalar_lea.sflag [#allocation6], %s938_s15 }
  0x56   : > { %s194_s16 = scalar_lea.vmem [#allocation5], %s529_s5 }
  0x57   : > { %740 = dma.done.wait (%p1054_p5), %s191_s29, 32  }
  0x58   : > { %742 = vsyncadd (%p1054_p5), %s191_s29, 4294967264  ;;  %v269_v0 = vlaneseq  ;;  %vm228_vm0 = vcmask 1043456   ;;  %v223_v4 = vld [vmem:[%s185_s6] sm:$0xff]  ;;  %v960_v5 = vld [vmem:[%s194_s16] sm:$0x3]  ;;  %s530_s21 = sshll.u32 %s938_s15, 2 }
  0x59   : > { %v226_v6 = vcombine.high %v223_v4, %v223_v4  ;;  %v229_v7 = vsel %vm228_vm0, %v223_v4, -inf  ;;  %vm267_vm1 = vcmp.ne.s32.totalorder %v960_v5, 4294967295  ;;  %v773_v63 = vmov 1966171168   ;;  %s219_s19 = scalar_lea.vmem [#allocation7], %s530_s21  ;;  %s539_s20 = sshll.u32 %s761_s12, 6 }
  0x5a   : > { %v952_v1 = vshrl.u32 %v269_v0, 7  ;;  %v230_v8 = vrot.slane %v229_v7, 4  ;;  %v268_v9 = vsel %vm267_vm1, %v960_v5, 0  ;;  %v319_v0 = vunpack.c.l.s4 %v773_v63  ;;  %s407_s30 = sshll.u32 %s219_s19, 4  ;;  %s993_s28 = scalar_lea.hbm %s1042_s2, %s539_s20  ;;  %s988_s30 = int_to_ptr.vmem [resolvable:$true] %s407_s30 }
  0x5b   : > { %v236_v10 = vsel %vm228_vm0, %v226_v6, -inf  ;;  %s391_s25 = scalar_lea.sflag [#allocation4], %s938_s15  ;;  %s683_s3 = scalar_lea.vmem %s988_s30, 64 }
  0x5c   : > { %v955_v2 = vsub.s32 0, %v952_v1  ;;  %v958_v3 = vsub.s32 1, %v952_v1  ;;  %v231_v13 = vmax.f32 %v229_v7, %v230_v8  ;;  %v237_v14 = vrot.slane %v236_v10, 4  ;;  %p684_p8 = scmp.ne.s32.totalorder %s988_s30, %s683_s3  ;;  %p1055_p0 = scmp.ne.s32.totalorder %s1047_s22, 0 }
  0x5d   : > { %v320_v8 = vunpack.c.0.s8 %v319_v0  ;;  %vm353_vm4 = vcmp.eq.s32.totalorder %v952_v1, 0  ;;  %s774_s12 = smov [#allocation7]  }
  0x5e   : > { %v274_v11 = vrot.slane %v268_v9, %v955_v2  ;;  %v278_v12 = vrot.slane %v268_v9, %v958_v3  ;;  %v232_v15 = vrot.slane %v231_v13, 2  ;;  %v238_v16 = vmax.f32 %v236_v10, %v237_v14  ;;  %p685_p7 = pnand %p684_p8, %p1055_p0  ;;  %s687_s7 = sshll.u32 %s774_s12, 4  ;;  %s688_s7 = int_to_ptr.vmem [resolvable:$false] %s687_s7 }
  0x5f   : > { %s689_s8 = scalar_lea.vmem %s688_s7, 128  ;;  %p690_p10 = scmp.lt.s32.totalorder %s988_s30, %s688_s7 }
  0x60   : > { %vm279_vm2 = vcmp.eq.s32.totalorder %v952_v1, %v274_v11  ;;  %vm280_vm3 = vcmp.eq.s32.totalorder %v952_v1, %v278_v12  ;;  %v233_v19 = vmax.f32 %v231_v13, %v232_v15  ;;  %v239_v20 = vrot.slane %v238_v16, 2  ;;  %p686_p4 = pneg %p685_p7  ;;  %p691_p12 = scmp.lt.s32.totalorder %s689_s8, %s683_s3 }
  0x61   : > { %v281_v17 = vsel %vm279_vm2, %v223_v4, 0.0  ;;  %v282_v18 = vsel %vm280_vm3, %v226_v6, 0.0 }
  0x62   : > { %v283_v21 = vsel %vm228_vm0, %v281_v17, 0.0  ;;  %v234_v22 = vrot.slane %v233_v19, 1  ;;  %v240_v23 = vmax.f32 %v238_v16, %v239_v20  ;;  %v290_v24 = vsel %vm228_vm0, %v282_v18, 0.0  ;;  %p692_p1 = por %p691_p12, %p690_p10 }
  0x63   : > { %v284_v27 = vrot.slane %v283_v21, 4  ;;  %v291_v28 = vrot.slane %v290_v24, 4  ;;  %v323_v17 = vsub.s32 %v320_v8, %v952_v1 }
  0x64   : > { %v235_v25 = vmax.f32 %v233_v19, %v234_v22  ;;  %v241_v26 = vrot.slane %v240_v23, 1  ;;  %p693_p2 = pnand %p692_p1, %p686_p4 }
  0x65   : > { %v285_v31 = vadd.f32 %v284_v27, %v283_v21  ;;  %v292_v32 = vadd.f32 %v291_v28, %v290_v24 }
  0x66   : > { %v242_v29 = vmax.f32 %v240_v23, %v241_v26 }
  0x67   : > { %v286_v35 = vrot.slane %v285_v31, 2  ;;  %v293_v36 = vrot.slane %v292_v32, 2 }
  0x68   : > { %v245_v30 = vcombine.low %v235_v25, %v242_v29 }
  0x69   : > { %v287_v37 = vadd.f32 %v286_v35, %v285_v31  ;;  %v294_v38 = vadd.f32 %v293_v36, %v292_v32 }
  0x6a   : > { %v247_v33 = vsub.f32 %v223_v4, %v245_v30 }
  0x6b   : > { %v288_v39 = vrot.slane %v287_v37, 1  ;;  %v295_v40 = vrot.slane %v294_v38, 1 }
  0x6c   : > { %v248_v34 = vmul.f32 1.442695, %v247_v33 }
  0x6d   : > { %v289_v42 = vadd.f32 %v288_v39, %v287_v37  ;;  %v296_v45 = vadd.f32 %v295_v40, %v294_v38 }
  0x6e   : > { %609 = vpow2.f32 %v248_v34 }
  0x6f   : > { %v305_v50 = vsub.f32 %v289_v42, %v235_v25  ;;  %v306_v51 = vsub.f32 %v296_v45, %v242_v29 }
  0x71   : > { %v307_v56 = vmul.f32 1.442695, %v305_v50  ;;  %v309_v57 = vmul.f32 1.442695, %v306_v51 }
  0x73   : > { %611 = vpow2.f32 %v307_v56 }
  0x74   : > { %613 = vpow2.f32 %v309_v57 }
  0x78   : > { %v610_v41 = vpop.eup %609 }
  0x79   : > { %v251_v43 = vcombine.high %v610_v41, %v610_v41  ;;  %v253_v44 = vsel %vm228_vm0, %v610_v41, 0.0 }
  0x7a   : > { %v254_v46 = vrot.slane %v253_v44, 4 }
  0x7b   : > { %v260_v47 = vsel %vm228_vm0, %v251_v43, 0.0 }
  0x7c   : > { %v255_v48 = vadd.f32 %v254_v46, %v253_v44  ;;  %v261_v49 = vrot.slane %v260_v47, 4 }
  0x7d   : > { %v612_v4 = vpop.eup %611 }
  0x7e   : > { %v256_v52 = vrot.slane %v255_v48, 2  ;;  %v262_v53 = vadd.f32 %v261_v49, %v260_v47  ;;  %v614_v6 = vpop.eup %613 }
  0x80   : > { %v257_v54 = vadd.f32 %v256_v52, %v255_v48  ;;  %v263_v55 = vrot.slane %v262_v53, 2 }
  0x82   : > { %v258_v58 = vrot.slane %v257_v54, 1  ;;  %v264_v59 = vadd.f32 %v263_v55, %v262_v53 }
  0x84   : > { %v259_v60 = vadd.f32 %v258_v58, %v257_v54  ;;  %v265_v61 = vrot.slane %v264_v59, 1 }
  0x86   : > { %v266_v62 = vadd.f32 %v265_v61, %v264_v59  ;;  %615 = vlog2.f32 %v259_v60 }
  0x87   : > { %617 = vrcp.f32 %v259_v60 }
  0x88   : > { %619 = vlog2.f32 %v266_v62 }
  0x89   : > { %621 = vrcp.f32 %v266_v62 }
  0x90   : > { %v616_v7 = vpop.eup %615 }
  0x91   : > { %v618_v9 = vpop.eup %617  ;;  %v298_v10 = vmul.f32 0.6931472, %v616_v7 }
  0x92   : > { %v620_v11 = vpop.eup %619  ;;  %v312_v12 = vmul.f32 %v618_v9, %v612_v4 }
  0x93   : > { %v622_v13 = vpop.eup %621  ;;  %v300_v14 = vmul.f32 0.6931472, %v620_v11  ;;  %v301_v15 = vadd.f32 %v298_v10, %v235_v25 }
  0x94   : > { %v314_v16 = vmul.f32 %v622_v13, %v614_v6 }
  0x95   : > { %v302_v18 = vadd.f32 %v300_v14, %v242_v29  ;;  %v303_v19 = vsub.f32 %v301_v15, %v289_v42 }
  0x96   : > { %v336_v20 = vcombine.low %v312_v12, %v314_v16 }
  0x97   : > { %v304_v21 = vsub.f32 %v302_v18, %v296_v45 }
  0x98   : > { %v343_v22 = vrot.slane %v336_v20, %v323_v17 }
  0x99   : > { %v317_v23 = vcombine.low %v303_v19, %v304_v21 }
  0x9a   : > { %v350_v24 = vrot.slane %v343_v22, %v323_v17 }
  0x9b   : > { %v324_v26 = vrot.slane %v317_v23, %v323_v17 }
  0x9c   : > { %v352_v27 = vsel %vm267_vm1, %v350_v24, 2.0 }
  0x9d   : > { %v331_v28 = vrot.slane %v324_v26, %v323_v17  ;;  %v369_v25 = vrot.slane %v352_v27, %v955_v2  ;;  %v373_v30 = vrot.slane %v352_v27, %v958_v3 }
  0x9f   : > { %v333_v29 = vsel %vm267_vm1, %v331_v28, 0.0 }
  0xa0   : > { %v358_v31 = vrot.slane %v333_v29, %v955_v2  ;;  %v362_v32 = vrot.slane %v333_v29, %v958_v3 }
  0xa2   : > { %v376_v33 = vsel %vm353_vm4, %v358_v31, %v369_v25  ;;  %v377_v34 = vsel %vm353_vm4, %v362_v32, %v373_v30 }
  0xa3   : > { %v380_v35 = vcombine.low %v376_v33, %v377_v34 }
  0xa5   : > { %531 = vst.sshfl [vmem:[%s219_s19] sm:$0x33 pattern:$0x76325410] %v380_v35 }
  0xa6   : > { %696 = shalt.err (!%p693_p2)
}
  0xa7   : > { %s697_s15 = scalar_lea.hbm %s993_s28, 64  ;;  %s701_s6 = scalar_lea.hbm %s1042_s2, 128 }
  0xa8   : > { %p698_p9 = scmp.ne.s32.totalorder %s993_s28, %s697_s15  ;;  %p702_p6 = scmp.lt.u32.totalorder %s993_s28, %s1042_s2 }
  0xa9   : > { %p703_p13 = scmp.lt.u32.totalorder %s701_s6, %s697_s15  ;;  %p705_p8 = scmp.lt.u32.totalorder %s697_s15, %s993_s28 }
  0xaa   : > { %p699_p11 = pnand %p698_p9, %p1055_p0 }
  0xab   : > { %p704_p5 = por %p703_p13, %p702_p6 }
  0xac   : > { %p700_p3 = pneg %p699_p11 }
  0xad   : > { %p706_p7 = por %p705_p8, %p704_p5 }
  0xaf   : > { %p707_p4 = pnand %p706_p7, %p700_p3 }
  0xb1   : > { %710 = shalt.err (!%p707_p4)
}
  0xb2   : > { %544 = dma.vmem_to_hbm [thread:$0]  (%p1055_p0), %s988_s30, 64, %s993_s28, %s391_s25  }
  0xb3 PF: > { %s419_s16 = sand.u32 1, %s749_s9   ;;  %p1056_p10 = scmp.ne.s32.totalorder %s1048_s24, 0 }
  0xb4   : > { %p1057_p12 = scmp.ge.s32.totalorder %s769_s14, 2  ;;  %s420_s21 = scalar_lea.sflag [#allocation4], %s419_s16 }
  0xb6   : > { %p554_p1 = pnand %p1057_p12, %p1056_p10 }
  0xb8   : > { %744 = dma.done.wait (!%p554_p1), %s420_s21, 64  }
  0xb9   : > { %746 = vsyncadd (!%p554_p1), %s420_s21, 4294967232  ;;  %s21_s14 = sadd.s32 1, %s769_s14   ;;  %s1058_s9 = smov %s753_s10 }
  0xba   : > { %p18_p2 = scmp.ge.s32.totalorder %s21_s14, 4   ;;  %s1059_s10 = smov %s757_s11 }
  0xbb   : > { %s1060_s11 = smov %s846_s23  ;;  %s1061_s12 = smov %s765_s13 }
  0xbc   : > { %s1062_s13 = smov %s1064_s17  ;;  %20 = sbr.rel (!%p18_p2) target bundleno = 8 (0x8), region = 86 }
  0xc3   :  { %425 = vsyncpa [#allocation3], 1 }
  0xc4   :  { %427 = vsyncpa [#allocation3 + $0x1], 1 }
  0xc5   :  { %428 = vsyncpa [#allocation6], 1 }
  0xc6   :  { %430 = vsyncpa [#allocation6 + $0x1], 1 }
  0xc7   :  { %431 = vsyncpa [#allocation4], 1 }
  0xc8   :  { %433 = vsyncpa [#allocation4 + $0x1], 1 }

</bundles_post_ra>
